<compile_context>
chip_gen: v7x
topology: tpu7x:2x2x1
jax: 0.10.0
libtpu: 0.0.40
codegen_flags: <defaults>
</compile_context>

<pallas_src>
from math import exp

import jax
import jax.numpy as jnp
import numpy as np
from jax.experimental import pallas as pl
from jax.experimental.pallas import tpu as pltpu

WINDOW_SIZE = 11
SIGMA = 1.5
C1 = 0.01 ** 2
C2 = 0.03 ** 2


# ----------------------------------------------------------------------------
# Parameter construction (plain numpy) — matches gaussian()/create_window().
# ----------------------------------------------------------------------------
def gaussian_1d(window_size, sigma):
    g = np.array(
        [exp(-(x - window_size // 2) ** 2 / float(2 * sigma ** 2))
         for x in range(window_size)],
        dtype=np.float64,
    )
    return (g / g.sum()).astype(np.float32)


def band_matrix(n, g):
    """A[i, j] = g[j - i + half]  (zero outside the band).

    For zero-padded 1-D 'same' convolution:  conv(x, g) == A @ x, and A is
    symmetric because g is.  Hence the depthwise 11x11 Gaussian conv on a
    channel slice X is A_h @ X @ A_w.
    """
    w = len(g)
    half = w // 2
    a = np.zeros((n, n), dtype=np.float32)
    for i in range(n):
        lo = max(0, i - half)
        hi = min(n, i + half + 1)
        for j in range(lo, hi):
            a[i, j] = g[j - i + half]
    return a


# ----------------------------------------------------------------------------
# Kernel 1: per-channel-block SSIM map + L1 partial sums.
# ----------------------------------------------------------------------------
def _ssim_l1_kernel(x1_ref, x2_ref, ah_ref, aw_ref, ssim_ref, l1_ref):
    cb, h, w = x1_ref.shape

    x1 = x1_ref[...]                      # (cb, H, W) float32
    x2 = x2_ref[...]
    ah = ah_ref[...]                      # (H, H) bfloat16, symmetric band
    aw = aw_ref[...]                      # (W, W) bfloat16, symmetric band

    # Stack the five blur inputs of all cb channels into one matrix so the
    # separable Gaussian blur is two big MXU matmuls instead of 12 small ones.
    # Products are formed in f32; only the matmul operands are cast to bf16.
    x1_2d = x1.reshape(cb * h, w)
    x2_2d = x2.reshape(cb * h, w)
    stacked = jnp.concatenate(
        [x1_2d, x2_2d, x1_2d * x1_2d, x2_2d * x2_2d, x1_2d * x2_2d], axis=0)
    b = 5 * cb                            # images in the stack

    # blur pass 1 (contract W):  (b*H, W) @ (W, W) -> (b*H, W), f32 accumulate.
    t = jnp.dot(stacked.astype(jnp.bfloat16), aw,
                preferred_element_type=jnp.float32)

    # blur pass 2 (contract H): transpose each image (XLU, minor-dims only) and
    # right-multiply by the symmetric H-band matrix.  Results stay in (W, H)
    # layout — fine, everything downstream is elementwise + full reduction.
    tt = jnp.swapaxes(t.reshape(b, h, w), 1, 2).reshape(b * w, h)
    u = jnp.dot(tt.astype(jnp.bfloat16), ah,
                preferred_element_type=jnp.float32)        # (b*W, H)

    rows = cb * w
    mu1 = u[0 * rows:1 * rows]
    mu2 = u[1 * rows:2 * rows]
    e11 = u[2 * rows:3 * rows]
    e22 = u[3 * rows:4 * rows]
    e12 = u[4 * rows:5 * rows]

    mu1_sq = mu1 * mu1
    mu2_sq = mu2 * mu2
    mu1_mu2 = mu1 * mu2
    sigma1_sq = e11 - mu1_sq
    sigma2_sq = e22 - mu2_sq
    sigma12 = e12 - mu1_mu2

    num = (2.0 * mu1_mu2 + C1) * (2.0 * sigma12 + C2)
    den = (mu1_sq + mu2_sq + C1) * (sigma1_sq + sigma2_sq + C2)
    ssim_map = num * pl.reciprocal(den, approx=True)       # divide on the EUP

    # Per-grid-step partial sums (own output block -> "parallel" axis is legal).
    ssim_ref[...] = jnp.sum(ssim_map, keepdims=True).reshape(1, 1, 1)
    l1_ref[...] = jnp.sum(jnp.abs(x1_2d - x2_2d), keepdims=True).reshape(1, 1, 1)


def _pick_channel_block(nc, h, w, budget_bytes=8 * 1024 * 1024):
    """Largest channel block that keeps ~16 live f32 HxW temporaries per channel
    under `budget_bytes` and leaves >=2 grid steps (so v7x megacore can split
    the parallel axis)."""
    per_chan = 16 * h * w * 4
    cap = max(1, budget_bytes // per_chan)
    divs = [d for d in range(1, nc + 1) if nc % d == 0 and d <= cap]
    multi = [d for d in divs if nc // d >= 2]
    if multi:
        return max(multi)
    return max(divs) if divs else 1


def ssim_and_l1_sums(x1, x2, ah, aw, cb):
    """x1, x2: (NC, H, W) float32.  Returns (sum(ssim_map), sum(|x1 - x2|))."""
    nc, h, w = x1.shape
    g = nc // cb
    ssim_p, l1_p = pl.pallas_call(
        _ssim_l1_kernel,
        out_shape=(
            jax.ShapeDtypeStruct((g, 1, 1), jnp.float32),
            jax.ShapeDtypeStruct((g, 1, 1), jnp.float32),
        ),
        grid_spec=pltpu.PrefetchScalarGridSpec(
            num_scalar_prefetch=0,
            grid=(g,),
            in_specs=[
                pl.BlockSpec((cb, h, w), lambda i: (i, 0, 0)),
                pl.BlockSpec((cb, h, w), lambda i: (i, 0, 0)),
                pl.BlockSpec((h, h), lambda i: (0, 0)),
                pl.BlockSpec((w, w), lambda i: (0, 0)),
            ],
            out_specs=(
                pl.BlockSpec((1, 1, 1), lambda i: (i, 0, 0)),
                pl.BlockSpec((1, 1, 1), lambda i: (i, 0, 0)),
            ),
        ),
        compiler_params=pltpu.CompilerParams(
            dimension_semantics=("parallel",)),
    )(x1, x2, ah, aw)
    return jnp.sum(ssim_p), jnp.sum(l1_p)


# ----------------------------------------------------------------------------
# Kernel 2: fused weighted, per-sample-gated L1 sum for the asym term.
#   accumulates  sum_k sum_n weight[k]*if_asym[n] * sum |est[k,n] - gt[n]|
# ----------------------------------------------------------------------------
def _asym_kernel(scale_ref, est_ref, gt_ref, acc_ref):
    n = pl.program_id(0)
    k = pl.program_id(1)

    @pl.when(jnp.logical_and(n == 0, k == 0))
    def _():
        acc_ref[...] = jnp.zeros_like(acc_ref)

    # Single multiply: scale = weight[k] * if_asym[n]; the mask array is never
    # materialised or DMA'd.
    d = jnp.abs(est_ref[...] - gt_ref[...])                 # (1,1,R,TM)
    part = scale_ref[...] * jnp.sum(d, keepdims=True)       # (1,1,1,1)
    acc_ref[...] += part.reshape(1, 1)


def _pick_lane_tile(m):
    for tm in (1024, 512, 384, 256, 128):
        if m % tm == 0:
            return tm
    return m            # fallback: whole flattened row (may be lane-padded)


def asym_weighted_l1_sum(est_stack, gt_noise, weight, if_asym_n):
    """est_stack: (Kest, N, C, H, W); gt_noise: (N, C, H, W)."""
    kest, n, c, h, w = est_stack.shape
    m = c * h * w
    tm = _pick_lane_tile(m)
    r = m // tm

    est4 = est_stack.reshape(kest, n, r, tm).astype(jnp.float32)
    gt3 = gt_noise.reshape(n, r, tm).astype(jnp.float32)
    scale = (weight.reshape(kest, 1) * if_asym_n.reshape(1, n))
    scale = scale.reshape(kest, n, 1, 1).astype(jnp.float32)

    out = pl.pallas_call(
        _asym_kernel,
        out_shape=jax.ShapeDtypeStruct((1, 1), jnp.float32),
        grid_spec=pltpu.PrefetchScalarGridSpec(
            num_scalar_prefetch=0,
            grid=(n, kest),        # n outer: gt block is DMA'd once per sample
            in_specs=[
                pl.BlockSpec((1, 1, 1, 1), lambda ni, ki: (ki, ni, 0, 0)),
                pl.BlockSpec((1, 1, r, tm), lambda ni, ki: (ki, ni, 0, 0)),
                pl.BlockSpec((1, r, tm), lambda ni, ki: (ni, 0, 0)),
            ],
            out_specs=pl.BlockSpec((1, 1), lambda ni, ki: (0, 0)),
        ),
        compiler_params=pltpu.CompilerParams(
            dimension_semantics=("arbitrary", "arbitrary")),
    )(scale, est4, gt3)
    return out[0, 0]


# ----------------------------------------------------------------------------
# fixed_loss.forward
# ----------------------------------------------------------------------------
def fixed_loss_forward(weight, out_image, gt_image, est_noise, gt_noise, if_asym):
    n, c, h, w = out_image.shape
    nc = n * c
    numel = n * c * h * w

    g1d = gaussian_1d(WINDOW_SIZE, SIGMA)
    # Band matrices in bf16: MXU operands only, accumulation stays f32.
    ah = jnp.asarray(band_matrix(h, g1d)).astype(jnp.bfloat16)
    aw = jnp.asarray(band_matrix(w, g1d)).astype(jnp.bfloat16)
    # TODO(synk): for large H/W, exploit the 11-tap band sparsity (banded-strip
    # matmuls or a pltpu.roll-based separable conv) and tile H with a 5-row
    # halo instead of dense HxH/WxW matrices (FLOP + VMEM savings, esp. v7x).

    x1 = out_image.reshape(nc, h, w).astype(jnp.float32)
    x2 = gt_image.reshape(nc, h, w).astype(jnp.float32)
    cb = _pick_channel_block(nc, h, w)
    ssim_sum, l1_sum = ssim_and_l1_sums(x1, x2, ah, aw, cb)

    l1_loss = l1_sum / numel                  # criterionL1 == nn.L1Loss() (mean)
    loss_ssim = -jnp.log10(ssim_sum / numel)  # log_SSIM_loss

    # if_asym is a per-sample gate in CBDNet (shape (N,1,1,1) or scalar).
    ia = jnp.asarray(if_asym, jnp.float32).reshape(-1)
    if ia.shape[0] == 1:
        ia = jnp.broadcast_to(ia, (n,))

    est_stack = jnp.stack([jnp.asarray(e, jnp.float32) for e in est_noise], axis=0)
    wvec = jnp.asarray(weight, jnp.float32).reshape(-1)[: est_stack.shape[0]]
    asym_loss = asym_weighted_l1_sum(est_stack, gt_noise, wvec, ia) / numel

    # tvloss is always 0 in the reference forward and unused.
    return l1_loss + 0.1 * asym_loss + 0.25 * loss_ssim


if __name__ == "__main__":
    key = jax.random.PRNGKey(0)
    k1, k2, k3, k4, k5 = jax.random.split(key, 5)

    N, C, H, W = 2, 3, 16, 16   # channel=3 fixed by log_SSIM_loss()
    out_image = jax.random.uniform(k1, (N, C, H, W), jnp.float32)
    gt_image = jax.random.uniform(k2, (N, C, H, W), jnp.float32)
    gt_noise = 0.1 * jax.random.normal(k3, (N, C, H, W), jnp.float32)
    est_noise = [
        0.1 * jax.random.normal(k4, (N, C, H, W), jnp.float32),
        0.1 * jax.random.normal(k5, (N, C, H, W), jnp.float32),
    ]
    if_asym = jnp.ones((N, 1, 1, 1), jnp.float32)
    weight = jnp.array([0.5, 1.0], jnp.float32)

    loss = fixed_loss_forward(weight, out_image, gt_image,
                              est_noise, gt_noise, if_asym)
    loss = jax.block_until_ready(loss)
    assert jnp.isfinite(loss), "loss is not finite"
    print("KERNEL_OK")
</pallas_src>

<mosaic_0001>
module attributes {stable_mosaic.version = 11 : i64} {
  func.func @_ssim_l1_kernel(%arg0: i32, %arg1: memref<3x16x16xf32, #tpu.memory_space<vmem>>, %arg2: memref<3x16x16xf32, #tpu.memory_space<vmem>>, %arg3: memref<16x16xbf16, #tpu.memory_space<vmem>>, %arg4: memref<16x16xbf16, #tpu.memory_space<vmem>>, %arg5: memref<1x1x1xf32, #tpu.memory_space<vmem>>, %arg6: memref<1x1x1xf32, #tpu.memory_space<vmem>>) attributes {dimension_semantics = [#tpu.dimension_semantics<parallel>], iteration_bounds = array<i64: 2>, scalar_prefetch = 0 : i64, scratch_operands = 0 : i64, tpu.core_type = #tpu.core_type<tc>, window_params = [{transform_indices = @transform_0, window_bounds = array<i64: 3, 16, 16>}, {transform_indices = @transform_1, window_bounds = array<i64: 3, 16, 16>}, {pipeline_mode = #tpu.pipeline_mode<synchronous>, transform_indices = @transform_2, window_bounds = array<i64: 16, 16>}, {pipeline_mode = #tpu.pipeline_mode<synchronous>, transform_indices = @transform_3, window_bounds = array<i64: 16, 16>}, {transform_indices = @transform_4, window_bounds = array<i64: 1, 1, 1>}, {transform_indices = @transform_5, window_bounds = array<i64: 1, 1, 1>}]} {
    %c0 = arith.constant 0 : index
    %c0_0 = arith.constant 0 : index
    %c0_1 = arith.constant 0 : index
    %0 = vector.load %arg1[%c0, %c0_0, %c0_1] : memref<3x16x16xf32, #tpu.memory_space<vmem>>, vector<3x16x16xf32>
    %c0_2 = arith.constant 0 : index
    %c0_3 = arith.constant 0 : index
    %c0_4 = arith.constant 0 : index
    %1 = vector.load %arg2[%c0_2, %c0_3, %c0_4] : memref<3x16x16xf32, #tpu.memory_space<vmem>>, vector<3x16x16xf32>
    %c0_5 = arith.constant 0 : index
    %c0_6 = arith.constant 0 : index
    %2 = vector.load %arg3[%c0_5, %c0_6] : memref<16x16xbf16, #tpu.memory_space<vmem>>, vector<16x16xbf16>
    %c0_7 = arith.constant 0 : index
    %c0_8 = arith.constant 0 : index
    %3 = vector.load %arg4[%c0_7, %c0_8] : memref<16x16xbf16, #tpu.memory_space<vmem>>, vector<16x16xbf16>
    %4 = vector.shape_cast %0 : vector<3x16x16xf32> to vector<48x16xf32>
    %5 = vector.shape_cast %1 : vector<3x16x16xf32> to vector<48x16xf32>
    %6 = arith.mulf %4, %4 : vector<48x16xf32>
    %7 = arith.mulf %5, %5 : vector<48x16xf32>
    %8 = arith.mulf %4, %5 : vector<48x16xf32>
    %9 = tpu.concatenate %4, %5, %6, %7, %8 in 0 : vector<48x16xf32>, vector<48x16xf32>, vector<48x16xf32>, vector<48x16xf32>, vector<48x16xf32> -> vector<240x16xf32>
    %10 = arith.truncf %9 : vector<240x16xf32> to vector<240x16xbf16>
    %cst = arith.constant dense<0.000000e+00> : vector<240x16xf32>
    %11 = tpu.matmul %10, %3, %cst {dimension_numbers = #tpu.dot_dimension_numbers<[1], [0], [0], [1], [0, 0, 1, 1], [], []>} : vector<240x16xbf16>, vector<16x16xbf16>, vector<240x16xf32> -> vector<240x16xf32>
    %12 = vector.shape_cast %11 : vector<240x16xf32> to vector<15x16x16xf32>
    %13 = tpu.transpose %12, [0, 2, 1] : vector<15x16x16xf32> -> vector<15x16x16xf32>
    %14 = vector.shape_cast %13 : vector<15x16x16xf32> to vector<240x16xf32>
    %15 = arith.truncf %14 : vector<240x16xf32> to vector<240x16xbf16>
    %cst_9 = arith.constant dense<0.000000e+00> : vector<240x16xf32>
    %16 = tpu.matmul %15, %2, %cst_9 {dimension_numbers = #tpu.dot_dimension_numbers<[1], [0], [0], [1], [0, 0, 1, 1], [], []>} : vector<240x16xbf16>, vector<16x16xbf16>, vector<240x16xf32> -> vector<240x16xf32>
    %17 = vector.extract_strided_slice %16 {offsets = [0, 0], sizes = [48, 16], strides = [1, 1]} : vector<240x16xf32> to vector<48x16xf32>
    %18 = vector.extract_strided_slice %16 {offsets = [48, 0], sizes = [48, 16], strides = [1, 1]} : vector<240x16xf32> to vector<48x16xf32>
    %19 = vector.extract_strided_slice %16 {offsets = [96, 0], sizes = [48, 16], strides = [1, 1]} : vector<240x16xf32> to vector<48x16xf32>
    %20 = vector.extract_strided_slice %16 {offsets = [144, 0], sizes = [48, 16], strides = [1, 1]} : vector<240x16xf32> to vector<48x16xf32>
    %21 = vector.extract_strided_slice %16 {offsets = [192, 0], sizes = [48, 16], strides = [1, 1]} : vector<240x16xf32> to vector<48x16xf32>
    %22 = arith.mulf %17, %17 : vector<48x16xf32>
    %23 = arith.mulf %18, %18 : vector<48x16xf32>
    %24 = arith.mulf %17, %18 : vector<48x16xf32>
    %25 = arith.subf %19, %22 : vector<48x16xf32>
    %26 = arith.subf %20, %23 : vector<48x16xf32>
    %27 = arith.subf %21, %24 : vector<48x16xf32>
    %cst_10 = arith.constant 2.000000e+00 : f32
    %28 = vector.broadcast %cst_10 : f32 to vector<48x16xf32>
    %29 = arith.mulf %28, %24 : vector<48x16xf32>
    %cst_11 = arith.constant 9.99999974E-5 : f32
    %30 = vector.broadcast %cst_11 : f32 to vector<48x16xf32>
    %31 = arith.addf %29, %30 : vector<48x16xf32>
    %cst_12 = arith.constant 2.000000e+00 : f32
    %32 = vector.broadcast %cst_12 : f32 to vector<48x16xf32>
    %33 = arith.mulf %32, %27 : vector<48x16xf32>
    %cst_13 = arith.constant 8.99999984E-4 : f32
    %34 = vector.broadcast %cst_13 : f32 to vector<48x16xf32>
    %35 = arith.addf %33, %34 : vector<48x16xf32>
    %36 = arith.mulf %31, %35 : vector<48x16xf32>
    %37 = arith.addf %22, %23 : vector<48x16xf32>
    %cst_14 = arith.constant 9.99999974E-5 : f32
    %38 = vector.broadcast %cst_14 : f32 to vector<48x16xf32>
    %39 = arith.addf %37, %38 : vector<48x16xf32>
    %40 = arith.addf %25, %26 : vector<48x16xf32>
    %cst_15 = arith.constant 8.99999984E-4 : f32
    %41 = vector.broadcast %cst_15 : f32 to vector<48x16xf32>
    %42 = arith.addf %40, %41 : vector<48x16xf32>
    %43 = arith.mulf %39, %42 : vector<48x16xf32>
    %44 = tpu.reciprocal %43 {approx = true} : vector<48x16xf32> -> vector<48x16xf32>
    %45 = arith.mulf %36, %44 : vector<48x16xf32>
    %46 = vector.shape_cast %45 : vector<48x16xf32> to vector<1x48x16xf32>
    %cst_16 = arith.constant dense<0.000000e+00> : vector<1xf32>
    %47 = vector.multi_reduction <add>, %46, %cst_16 [1, 2] : vector<1x48x16xf32> to vector<1xf32>
    %48 = vector.shape_cast %47 : vector<1xf32> to vector<1x1x1xf32>
    %49 = vector.extract %48[0, 0, 0] : f32 from vector<1x1x1xf32>
    %50 = vector.broadcast %49 : f32 to vector<1x1xf32>
    %51 = vector.shape_cast %50 : vector<1x1xf32> to vector<1x1x1xf32>
    %c0_17 = arith.constant 0 : index
    %c0_18 = arith.constant 0 : index
    %c0_19 = arith.constant 0 : index
    %52 = vector.load %arg5[%c0_17, %c0_18, %c0_19] : memref<1x1x1xf32, #tpu.memory_space<vmem>>, vector<1x1x1xf32>
    tpu.vector_store %arg5[%c0_17, %c0_18, %c0_19], %51 {strides = array<i32>} : memref<1x1x1xf32, #tpu.memory_space<vmem>>, vector<1x1x1xf32>,
    %53 = arith.subf %4, %5 : vector<48x16xf32>
    %54 = math.absf %53 : vector<48x16xf32>
    %55 = vector.shape_cast %54 : vector<48x16xf32> to vector<1x48x16xf32>
    %cst_20 = arith.constant dense<0.000000e+00> : vector<1xf32>
    %56 = vector.multi_reduction <add>, %55, %cst_20 [1, 2] : vector<1x48x16xf32> to vector<1xf32>
    %57 = vector.shape_cast %56 : vector<1xf32> to vector<1x1x1xf32>
    %58 = vector.extract %57[0, 0, 0] : f32 from vector<1x1x1xf32>
    %59 = vector.broadcast %58 : f32 to vector<1x1xf32>
    %60 = vector.shape_cast %59 : vector<1x1xf32> to vector<1x1x1xf32>
    %c0_21 = arith.constant 0 : index
    %c0_22 = arith.constant 0 : index
    %c0_23 = arith.constant 0 : index
    %61 = vector.load %arg6[%c0_21, %c0_22, %c0_23] : memref<1x1x1xf32, #tpu.memory_space<vmem>>, vector<1x1x1xf32>
    tpu.vector_store %arg6[%c0_21, %c0_22, %c0_23], %60 {strides = array<i32>} : memref<1x1x1xf32, #tpu.memory_space<vmem>>, vector<1x1x1xf32>,
    return
  }
  func.func @transform_0(%arg0: i32) -> (i32, i32, i32) {
    %c0_i32 = arith.constant 0 : i32
    %c0_i32_0 = arith.constant 0 : i32
    %c0_i32_1 = arith.constant 0 : i32
    return %arg0, %c0_i32, %c0_i32_0 : i32, i32, i32
  }
  func.func @transform_1(%arg0: i32) -> (i32, i32, i32) {
    %c0_i32 = arith.constant 0 : i32
    %c0_i32_0 = arith.constant 0 : i32
    %c0_i32_1 = arith.constant 0 : i32
    return %arg0, %c0_i32, %c0_i32_0 : i32, i32, i32
  }
  func.func @transform_2(%arg0: i32) -> (i32, i32) {
    %c0_i32 = arith.constant 0 : i32
    %c0_i32_0 = arith.constant 0 : i32
    %c0_i32_1 = arith.constant 0 : i32
    return %c0_i32, %c0_i32_0 : i32, i32
  }
  func.func @transform_3(%arg0: i32) -> (i32, i32) {
    %c0_i32 = arith.constant 0 : i32
    %c0_i32_0 = arith.constant 0 : i32
    %c0_i32_1 = arith.constant 0 : i32
    return %c0_i32, %c0_i32_0 : i32, i32
  }
  func.func @transform_4(%arg0: i32) -> (i32, i32, i32) {
    %c0_i32 = arith.constant 0 : i32
    %c0_i32_0 = arith.constant 0 : i32
    %c0_i32_1 = arith.constant 0 : i32
    return %arg0, %c0_i32, %c0_i32_0 : i32, i32, i32
  }
  func.func @transform_5(%arg0: i32) -> (i32, i32, i32) {
    %c0_i32 = arith.constant 0 : i32
    %c0_i32_0 = arith.constant 0 : i32
    %c0_i32_1 = arith.constant 0 : i32
    return %arg0, %c0_i32, %c0_i32_0 : i32, i32, i32
  }
}

</mosaic_0001>

<bundles_post_ra>
// kernel: tpu_custom_call.1
= control target key start
LH: loop header
LB: loop body
LE: loop exit
PB: predicated region body
PF: predicated region fallthrough
CT: control target
= control target key end

     0   :  { %11 = vsyncpa [#allocation3], 0  ;;  %s2425_s0 = inlined_call_operand.hbm [shape: f32[6,16,16], index: 0, kind: input, shape index: {}]   ;;  %s2426_s1 = inlined_call_operand.hbm [shape: f32[6,16,16], index: 1, kind: input, shape index: {}]   ;;  %s2427_s2 = inlined_call_operand.hbm [shape: bf16[16,16], index: 2, kind: input, shape index: {}]   ;;  %s2428_s3 = inlined_call_operand.vmem [shape: bf16[16,16], index: 3, kind: input, shape index: {}]   ;;  %s2429_s4 = inlined_call_operand.vmem [shape: f32[2,1,1], index: 4, kind: output, shape index: {0}]   ;;  %s2430_s5 = inlined_call_operand.vmem [shape: f32[2,1,1], index: 5, kind: output, shape index: {1}]  }
   0x1   :  { %13 = vsyncpa [#allocation3 + $0x1], 0 }
   0x2   :  { %14 = vsyncpa [#allocation5], 0 }
   0x3   :  { %16 = vsyncpa [#allocation5 + $0x1], 0  ;;  %s2002_s18 = smov 0   ;;  %s2004_s19 = smov 0  }
   0x4   :  { %s2006_s20 = smov 0   ;;  %s2008_s21 = smov 0  }
   0x5 LB: > { %s2021_s22 = sadd.s32 4294967295, %s1961_s21   ;;  %p42_p0 = scmp.ne.s32.totalorder %s1953_s19, %s1949_s18  ;;  %s1961_s21 = sphi %s2008_s21, %s2446_s21   ;;  %s1957_s20 = sphi %s2006_s20, %s2445_s20   ;;  %s1953_s19 = sphi %s2004_s19, %s2444_s19   ;;  %s1949_s18 = sphi %s2002_s18, %s2443_s18  }
   0x6   : > { %p2431_p1 = scmp.eq.s32.totalorder %s2021_s22, 0  ;;  %p1544_p2 = scmp.ge.s32.totalorder %s1961_s21, 1 }
   0x7   : > { %p173_p3 = scmp.lt.s32.totalorder %s1961_s21, 3  ;;  %s1963_s25 = smov [#allocation6]  }
   0x8   : > { %p2029_p4 = por %p2431_p1, %p42_p0  ;;  %s185_s26 = sshll.u32 %s1963_s25, 4  ;;  %s186_s26 = int_to_ptr.vmem [resolvable:$true] %s185_s26 }
   0x9   : > { %p2033_p5 = pnand %p1544_p2, %p173_p3  ;;  %s2046_s28 = sadd.s32 1, %s1961_s21  }
   0xa   : > { %s2434_s23 = scalar_select %p2029_p4, 1, 0 }
   0xb   : > { %s2435_s24 = scalar_select %p2033_p5, 1, 0 }
   0xc   : > { %p1764_p6 = pneg %p2033_p5  ;;  %s29_s29 = sadd.s32 1, %s1957_s20 }
   0xd   : > { %s26_s30 = ssub.s32 %s1961_s21, %s2046_s28  ;;  %s1831_s8 = scalar_lea.hbm %s2427_s2, 128 }
   0xe   : > { %p2041_p7 = pnand %p1764_p6, %p2431_p1  ;;  %p1832_p8 = scmp.ne.s32.totalorder %s2427_s2, %s1831_s8 }
   0xf   : > { %p1838_p12 = scmp.lt.u32.totalorder %s1831_s8, %s2427_s2 }
  0x10   : > { %p1833_p9 = pneg %p2041_p7 }
  0x12   : > { %p1834_p10 = pnand %p1833_p9, %p1832_p8 }
  0x14   : > { %p1835_p11 = pneg %p1834_p10 }
  0x16   : > { %p1840_p13 = pnand %p1838_p12, %p1835_p11 }
  0x18   : > { %1843 = shalt.err (!%p1840_p13)
}
  0x19   : > { %s1844_s13 = scalar_lea.vmem %s186_s26, 128  ;;  %p1852_p6 = scmp.lt.s32.totalorder %s186_s26, %s186_s26 }
  0x1a   : > { %p1845_p0 = scmp.ne.s32.totalorder %s186_s26, %s1844_s13  ;;  %p1853_p1 = scmp.lt.s32.totalorder %s1844_s13, %s1844_s13 }
  0x1c   : > { %p1847_p2 = pnand %p1845_p0, %p1833_p9  ;;  %p1854_p4 = por %p1853_p1, %p1852_p6 }
  0x1e   : > { %p1848_p3 = pneg %p1847_p2 }
  0x20   : > { %p1855_p5 = pnand %p1854_p4, %p1848_p3 }
  0x22   : > { %1858 = shalt.err (!%p1855_p5)
}
  0x23   : > { %s1964_s14 = smov 64   ;;  %s1965_s15 = smov 4  }
  0x24   : > { %1767 = dma.hbm_to_vmem [thread:$0]  (!%p2041_p7), %s2427_s2, 128, %s186_s26, [#allocation5], %s1964_s14, %s1964_s14, %s1965_s15  }
  0x25   : > { %p27_p1 = scmp.eq.s32.totalorder %s26_s30, 0  ;;  %p36_p4 = scmp.ne.s32.totalorder %s1957_s20, %s1953_s19 }
  0x26   : > { %p37_p5 = scmp.eq.s32.totalorder %s1961_s21, 0  ;;  %p1776_p8 = scmp.lt.s32.totalorder %s1961_s21, 2 }
  0x27   : > { %s2072_s18 = scalar_select %p27_p1, %s1957_s20, %s29_s29  }
  0x28   : > { %p38_p9 = por %p37_p5, %p36_p4  ;;  %s202_s25 = sand.u32 1, %s1957_s20  }
  0x29   : > { %s2075_s6 = smul.u32 48, %s202_s25  ;;  %s224_s10 = sand.u32 1, %s1961_s21  }
  0x2a   : > { %s1591_s7 = smul.u32 768, %s1961_s21  ;;  %p2078_p10 = pnand %p1776_p8, %p38_p9 }
  0x2b   : > { %s206_s29 = scalar_lea.vmem [#allocation2], %s2075_s6  ;;  %s2093_s11 = scalar_lea.sflag [#allocation3], %s202_s25 }
  0x2c   : > { %s2087_s26 = scalar_lea.hbm %s2425_s0, %s1591_s7  ;;  %s214_s30 = sshll.u32 %s206_s29, 4  ;;  %s2090_s30 = int_to_ptr.vmem [resolvable:$true] %s214_s30 }
  0x2d   : > { %s1859_s12 = scalar_lea.hbm %s2087_s26, 768  ;;  %p1861_p11 = pneg %p2078_p10 }
  0x2e   : > { %p1860_p7 = scmp.ne.s32.totalorder %s2087_s26, %s1859_s12  ;;  %s1864_s15 = scalar_lea.hbm %s2425_s0, 1536 }
  0x2f   : > { %p1865_p0 = scmp.lt.u32.totalorder %s2087_s26, %s2425_s0  ;;  %p1866_p2 = scmp.lt.u32.totalorder %s1864_s15, %s1859_s12 }
  0x30   : > { %p1862_p12 = pnand %p1861_p11, %p1860_p7  ;;  %p1868_p6 = scmp.lt.u32.totalorder %s1859_s12, %s2087_s26 }
  0x31   : > { %p1867_p3 = por %p1866_p2, %p1865_p0 }
  0x32   : > { %p1863_p13 = pneg %p1862_p12 }
  0x33   : > { %p1869_p1 = por %p1868_p6, %p1867_p3 }
  0x35   : > { %p1870_p4 = pnand %p1869_p1, %p1863_p13 }
  0x37   : > { %1873 = shalt.err (!%p1870_p4)
}
  0x38   : > { %s1874_s25 = scalar_lea.vmem %s2090_s30, 768  ;;  %s1966_s27 = smov [#allocation2]  }
  0x39   : > { %p1875_p5 = scmp.ne.s32.totalorder %s2090_s30, %s1874_s25  ;;  %s1879_s9 = sshll.u32 %s1966_s27, 4  ;;  %s1880_s9 = int_to_ptr.vmem [resolvable:$false] %s1879_s9 }
  0x3a   : > { %s1881_s29 = scalar_lea.vmem %s1880_s9, 1536  ;;  %p1882_p7 = scmp.lt.s32.totalorder %s2090_s30, %s1880_s9 }
  0x3b   : > { %p1877_p8 = pnand %p1875_p5, %p1861_p11  ;;  %p1883_p12 = scmp.lt.s32.totalorder %s1881_s29, %s1874_s25 }
  0x3d   : > { %p1878_p9 = pneg %p1877_p8  ;;  %p1884_p0 = por %p1883_p12, %p1882_p7 }
  0x3f   : > { %p1885_p2 = pnand %p1884_p0, %p1878_p9 }
  0x41   : > { %1888 = shalt.err (!%p1885_p2)
}
  0x42   : > { %s1967_s12 = smov 128   ;;  %s1968_s13 = smov 8  }
  0x43   : > { %1771 = dma.hbm_to_vmem [thread:$0]  (!%p2078_p10), %s2087_s26, 768, %s2090_s30, %s2093_s11, %s1967_s12, %s1967_s12, %s1968_s13  }
  0x44   : > { %s2129_s16 = scalar_lea.hbm %s2426_s1, %s1591_s7  ;;  %s228_s17 = scalar_lea.vmem [#allocation4], %s2075_s6 }
  0x45   : > { %s236_s25 = sshll.u32 %s228_s17, 4  ;;  %s2136_s27 = scalar_lea.sflag [#allocation5], %s224_s10  ;;  %s2132_s25 = int_to_ptr.vmem [resolvable:$true] %s236_s25 }
  0x46   : > { %s1889_s9 = scalar_lea.hbm %s2129_s16, 768  ;;  %s1894_s30 = scalar_lea.hbm %s2426_s1, 1536 }
  0x47   : > { %p1890_p13 = scmp.ne.s32.totalorder %s2129_s16, %s1889_s9  ;;  %p1895_p1 = scmp.lt.u32.totalorder %s2129_s16, %s2426_s1 }
  0x48   : > { %p1896_p4 = scmp.lt.u32.totalorder %s1894_s30, %s1889_s9  ;;  %p1898_p8 = scmp.lt.u32.totalorder %s1889_s9, %s2129_s16 }
  0x49   : > { %p1892_p3 = pnand %p1890_p13, %p1861_p11 }
  0x4a   : > { %p1897_p5 = por %p1896_p4, %p1895_p1 }
  0x4b   : > { %p1893_p6 = pneg %p1892_p3 }
  0x4c   : > { %p1899_p9 = por %p1898_p8, %p1897_p5 }
  0x4e   : > { %p1900_p7 = pnand %p1899_p9, %p1893_p6 }
  0x50   : > { %1903 = shalt.err (!%p1900_p7)
}
  0x51   : > { %s1904_s21 = scalar_lea.vmem %s2132_s25, 768  ;;  %s1969_s6 = smov [#allocation4]  }
  0x52   : > { %p1905_p12 = scmp.ne.s32.totalorder %s2132_s25, %s1904_s21  ;;  %s1909_s10 = sshll.u32 %s1969_s6, 4  ;;  %s1910_s10 = int_to_ptr.vmem [resolvable:$false] %s1909_s10 }
  0x53   : > { %s1911_s14 = scalar_lea.vmem %s1910_s10, 1536  ;;  %p1912_p13 = scmp.lt.s32.totalorder %s2132_s25, %s1910_s10 }
  0x54   : > { %p1907_p0 = pnand %p1905_p12, %p1861_p11  ;;  %p1913_p3 = scmp.lt.s32.totalorder %s1911_s14, %s1904_s21 }
  0x56   : > { %p1908_p2 = pneg %p1907_p0  ;;  %p1914_p1 = por %p1913_p3, %p1912_p13 }
  0x58   : > { %p1915_p4 = pnand %p1914_p1, %p1908_p2 }
  0x5a   : > { %1918 = shalt.err (!%p1915_p4)
}
  0x5b   : > { %1774 = dma.hbm_to_vmem [thread:$0]  (!%p2078_p10), %s2129_s16, 768, %s2132_s25, %s2136_s27, %s1967_s12, %s1967_s12, %s1968_s13  }
  0x5c   : > { %p2438_p11 = scmp.ne.s32.totalorder %s2435_s24, 0 }
  0x5d   : > { %s250_s15 = sand.u32 (!%p2438_p11), 1, %s1953_s19   ;;  %p2439_p6 = scmp.ne.s32.totalorder (!%p2438_p11), %s2434_s23, 0 }
  0x5e   : > { %248 = sbr.rel (%p2438_p11) target bundleno = 1007 (0x3ef), region = 36  ;;  %s251_s9 = scalar_lea.sflag (!%p2438_p11), [#allocation3], %s250_s15 }
  0x5f   : > { %s1751_s17 = smul.u32 (!%p2438_p11), 48, %s250_s15 }
  0x61   : > { %s254_s26 = scalar_lea.vmem (!%p2438_p11), [#allocation2], %s1751_s17 }
  0x65   : > { %1936 = dma.done.wait (%p2439_p6), %s251_s9, 768  }
  0x66   : > { %1938 = vsyncadd (%p2439_p6), %s251_s9, 4294966528  ;;  %s259_s8 = sand.u32 1, %s2021_s22   ;;  %s2173_s30 = scalar_lea.vmem [#allocation4], %s1751_s17 }
  0x67   : > { %s260_s7 = scalar_lea.sflag [#allocation5], %s259_s8 }
  0x68   : > { %1940 = dma.done.wait (%p2439_p6), %s260_s7, 768  }
  0x69   : > { %1942 = vsyncadd (%p2439_p6), %s260_s7, 4294966528  ;;  %p2440_p10 = scmp.eq.s32.totalorder %s2021_s22, 0 }
  0x6b   : > { %1944 = dma.done.wait (%p2440_p10), [#allocation5], 128   ;;  %p2441_p5 = pmov %p2440_p10 }
  0x6c   : > { %v1970_v0 = vmov 0.0   ;;  %vm1971_vm0 = vmmov 0   ;;  %v1817_v1 = vld [vmem:[%s2428_s3] sm:$0xff]   ;;  %v2194_v3 = vld [vmem:[%s254_s26 + $0x8] sm:$0xff]  ;;  %vm364_vm1 = vcmask 130048   ;;  %v2203_v6 = vld [vmem:[%s254_s26 + $0x18] sm:$0xff] }
  0x6d   : > { %1946 = vsyncadd (%p2441_p5), [#allocation5], 4294967168  ;;  %1625 = vmatprep.subr.bf16.mxu0 %v1970_v0  ;;  %1627 = vmatprep.mubr.msk.bf16.mxu0 %vm1971_vm0, %v1970_v0  ;;  %v2192_v2 = vld [vmem:[%s254_s26] sm:$0xff]  ;;  %v2201_v5 = vld [vmem:[%s254_s26 + $0x10] sm:$0xff]  ;;  %v326_v21 = vmul.f32 %v2194_v3, %v2194_v3  ;;  %v328_v24 = vmul.f32 %v2203_v6, %v2203_v6  ;;  %p302_p8 = scmp.lt.s32.totalorder %s2021_s22, 1  ;;  %vm1391_vm2 = vcmask 0  }
  0x6e   : > { %1687 = vmatprep.subr.bf16.mxu1 %v1970_v0  ;;  %1689 = vmatprep.mubr.msk.bf16.mxu1 %vm1971_vm0, %v1970_v0  ;;  %v343_v4 = vpack.c.bf16 %v2194_v3, %v2192_v2  ;;  %v344_v7 = vpack.c.bf16 %v2203_v6, %v2201_v5  ;;  %v2210_v8 = vld [vmem:[%s254_s26 + $0x20] sm:$0xff]  ;;  %v2212_v9 = vld [vmem:[%s254_s26 + $0x28] sm:$0xff]  ;;  %v2231_v14 = vld [vmem:[%s2173_s30 + $0x10] sm:$0xff]  ;;  %v325_v20 = vmul.f32 %v2192_v2, %v2192_v2 }
  0x6f   : > { %1626 = vmatpush3.bf16.msra.mxu0 %v1817_v1  ;;  %v345_v10 = vpack.c.bf16 %v2212_v9, %v2210_v8  ;;  %v2220_v11 = vld [vmem:[%s2173_s30] sm:$0xff]  ;;  %v2223_v12 = vld [vmem:[%s2173_s30 + $0x8] sm:$0xff]  ;;  %v2234_v15 = vld [vmem:[%s2173_s30 + $0x18] sm:$0xff]  ;;  %v327_v23 = vmul.f32 %v2201_v5, %v2201_v5  ;;  %v329_v26 = vmul.f32 %v2210_v8, %v2210_v8  ;;  %v330_v27 = vmul.f32 %v2212_v9, %v2212_v9  ;;  %s2448_s22 = smov (!%p302_p8, %s2021_s22), 1 }
  0x70   : > { %v346_v13 = vpack.c.bf16 %v2223_v12, %v2220_v11  ;;  %v347_v16 = vpack.c.bf16 %v2234_v15, %v2231_v14  ;;  %v2242_v17 = vld [vmem:[%s2173_s30 + $0x20] sm:$0xff]  ;;  %v2245_v18 = vld [vmem:[%s2173_s30 + $0x28] sm:$0xff]  ;;  %v349_v22 = vpack.c.bf16 %v326_v21, %v325_v20  ;;  %v331_v29 = vmul.f32 %v2220_v11, %v2220_v11  ;;  %s304_s16 = scalar_lea.vmem %s2429_s4, %s2448_s22  ;;  %s307_s29 = scalar_lea.vmem %s2430_s5, %s2448_s22 }
  0x71   : > { %v348_v19 = vpack.c.bf16 %v2245_v18, %v2242_v17  ;;  %v350_v25 = vpack.c.bf16 %v328_v24, %v327_v23  ;;  %v351_v28 = vpack.c.bf16 %v330_v27, %v329_v26  ;;  %v332_v30 = vmul.f32 %v2223_v12, %v2223_v12  ;;  %v1818_v49 = vld [vmem:[#allocation6] sm:$0xff]  }
  0x72   : > { %1628 = vmatmul.mubr.msk.bf16.vlgmr.msra.gmra.mrb[0].mxu0 %vm364_vm1, %v343_v4  ;;  %v333_v32 = vmul.f32 %v2231_v14, %v2231_v14  ;;  %v334_v33 = vmul.f32 %v2234_v15, %v2234_v15  ;;  %v335_v35 = vmul.f32 %v2242_v17, %v2242_v17  ;;  %v336_v36 = vmul.f32 %v2245_v18, %v2245_v18 }
  0x73   : > { %1631 = vmatprep.mubr.msk.bf16.mxu0 %vm1971_vm0, %v1970_v0  ;;  %v352_v31 = vpack.c.bf16 %v332_v30, %v331_v29  ;;  %v337_v38 = vmul.f32 %v2220_v11, %v2192_v2  ;;  %v338_v39 = vmul.f32 %v2223_v12, %v2194_v3  ;;  %v339_v41 = vmul.f32 %v2231_v14, %v2201_v5 }
  0x74   : > { %v353_v34 = vpack.c.bf16 %v334_v33, %v333_v32  ;;  %v354_v37 = vpack.c.bf16 %v336_v36, %v335_v35  ;;  %v340_v42 = vmul.f32 %v2234_v15, %v2203_v6  ;;  %v341_v44 = vmul.f32 %v2242_v17, %v2210_v8  ;;  %1688 = vmatpush3.bf16.msra.mxu1 %v1818_v49 }
  0x75   : > { %v355_v40 = vpack.c.bf16 %v338_v39, %v337_v38  ;;  %v342_v45 = vmul.f32 %v2245_v18, %v2212_v9 }
  0x76   : > { %v356_v43 = vpack.c.bf16 %v340_v42, %v339_v41 }
  0x77   : > { %v357_v46 = vpack.c.bf16 %v342_v45, %v341_v44 }
  0x7a   : > { %1632 = vmatmul.mubr.msk.bf16.gmra.mrb[4].mxu0 %vm364_vm1, %v344_v7 }
  0x7b   : > { %1635 = vmatprep.mubr.msk.bf16.mxu0 %vm1971_vm0, %v1970_v0 }
  0x82   : > { %1636 = vmatmul.mubr.msk.bf16.gmra.mrb[8].mxu0 %vm364_vm1, %v345_v10 }
  0x83   : > { %1639 = vmatprep.mubr.msk.bf16.mxu0 %vm1971_vm0, %v1970_v0 }
  0x8a   : > { %1640 = vmatmul.mubr.msk.bf16.gmra.mrb[12].mxu0 %vm364_vm1, %v346_v13 }
  0x8b   : > { %1643 = vmatprep.mubr.msk.bf16.mxu0 %vm1971_vm0, %v1970_v0 }
  0x92   : > { %1644 = vmatmul.mubr.msk.bf16.gmra.mrb[16].mxu0 %vm364_vm1, %v347_v16 }
  0x93   : > { %1647 = vmatprep.mubr.msk.bf16.mxu0 %vm1971_vm0, %v1970_v0 }
  0x9a   : > { %1648 = vmatmul.mubr.msk.bf16.gmra.mrb[20].mxu0 %vm364_vm1, %v348_v19 }
  0x9b   : > { %1651 = vmatprep.mubr.msk.bf16.mxu0 %vm1971_vm0, %v1970_v0 }
  0xa2   : > { %1652 = vmatmul.mubr.msk.bf16.gmra.mrb[24].mxu0 %vm364_vm1, %v349_v22 }
  0xa3   : > { %1655 = vmatprep.mubr.msk.bf16.mxu0 %vm1971_vm0, %v1970_v0 }
  0xaa   : > { %1656 = vmatmul.mubr.msk.bf16.gmra.mrb[28].mxu0 %vm364_vm1, %v350_v25 }
  0xab   : > { %1659 = vmatprep.mubr.msk.bf16.mxu0 %vm1971_vm0, %v1970_v0 }
  0xb2   : > { %1660 = vmatmul.mubr.msk.bf16.gmra.mrb[32].mxu0 %vm364_vm1, %v351_v28 }
  0xb3   : > { %1663 = vmatprep.mubr.msk.bf16.mxu0 %vm1971_vm0, %v1970_v0 }
  0xba   : > { %1664 = vmatmul.mubr.msk.bf16.gmra.mrb[36].mxu0 %vm364_vm1, %v352_v31 }
  0xbb   : > { %1667 = vmatprep.mubr.msk.bf16.mxu0 %vm1971_vm0, %v1970_v0 }
  0xc2   : > { %1668 = vmatmul.mubr.msk.bf16.gmra.mrb[40].mxu0 %vm364_vm1, %v353_v34 }
  0xc3   : > { %1671 = vmatprep.mubr.msk.bf16.mxu0 %vm1971_vm0, %v1970_v0 }
  0xca   : > { %1672 = vmatmul.mubr.msk.bf16.gmra.mrb[44].mxu0 %vm364_vm1, %v354_v37 }
  0xcb   : > { %1675 = vmatprep.mubr.msk.bf16.mxu0 %vm1971_vm0, %v1970_v0 }
  0xd2   : > { %1676 = vmatmul.mubr.msk.bf16.gmra.mrb[48].mxu0 %vm364_vm1, %v355_v40 }
  0xd3   : > { %1679 = vmatprep.mubr.msk.bf16.mxu0 %vm1971_vm0, %v1970_v0 }
  0xda   : > { %1680 = vmatmul.mubr.msk.bf16.gmra.mrb[52].mxu0 %vm364_vm1, %v356_v43 }
  0xdb   : > { %1683 = vmatprep.mubr.msk.bf16.mxu0 %vm1971_vm0, %v1970_v0 }
  0xe2   : > { %1684 = vmatmul.mubr.msk.bf16.gmra.mrb[56].mxu0 %vm364_vm1, %v357_v46 }
 0x145   : > { %v444_v47 = vpop.f32.mrb[0].mxu0 }
 0x146   : > { %563 = vxpose.xlu0.b32.start [1/2] (short) (narrow) %v444_v47, 16  ;;  %v1629_v48 = vpop.f32.mrb[1].mxu0 }
 0x147   : > { %v447_v50 = vpop.f32.mrb[2].mxu0 }
 0x148   : > { %v1630_v51 = vpop.f32.mrb[3].mxu0 }
 0x14a   : > { %564 = vxpose.xlu0.b32.end [2/2] (short) (narrow) %v447_v50, 16 }
 0x14d   : > { %v452_v52 = vpop.f32.mrb[4].mxu0 }
 0x14e   : > { %595 = vxpose.xlu1.b32.start [1/2] (short) (narrow) %v452_v52, 16  ;;  %v1633_v53 = vpop.f32.mrb[5].mxu0 }
 0x14f   : > { %v455_v54 = vpop.f32.mrb[6].mxu0 }
 0x150   : > { %v1634_v55 = vpop.f32.mrb[7].mxu0 }
 0x152   : > { %596 = vxpose.xlu1.b32.end [2/2] (short) (narrow) %v455_v54, 16 }
 0x155   : > { %v460_v56 = vpop.f32.mrb[8].mxu0 }
 0x156   : > { %627 = vxpose.xlu0.b32.start [1/2] (short) (narrow) %v460_v56, 16  ;;  %v1637_v57 = vpop.f32.mrb[9].mxu0 }
 0x157   : > { %v463_v58 = vpop.f32.mrb[10].mxu0 }
 0x158   : > { %v1638_v59 = vpop.f32.mrb[11].mxu0 }
 0x15a   : > { %628 = vxpose.xlu0.b32.end [2/2] (short) (narrow) %v463_v58, 16 }
 0x15d   : > { %v468_v60 = vpop.f32.mrb[12].mxu0 }
 0x15e   : > { %659 = vxpose.xlu1.b32.start [1/2] (short) (narrow) %v468_v60, 16  ;;  %v1641_v61 = vpop.f32.mrb[13].mxu0 }
 0x15f   : > { %v471_v62 = vpop.f32.mrb[14].mxu0 }
 0x160   : > { %v1642_v63 = vpop.f32.mrb[15].mxu0 }
 0x162   : > { %660 = vxpose.xlu1.b32.end [2/2] (short) (narrow) %v471_v62, 16 }
 0x165   : > { %v476_v1 = vpop.f32.mrb[16].mxu0 }
 0x166   : > { %691 = vxpose.xlu0.b32.start [1/2] (short) (narrow) %v476_v1, 16  ;;  %v1645_v4 = vpop.f32.mrb[17].mxu0 }
 0x167   : > { %v479_v7 = vpop.f32.mrb[18].mxu0 }
 0x168   : > { %v1646_v10 = vpop.f32.mrb[19].mxu0 }
 0x16a   : > { %692 = vxpose.xlu0.b32.end [2/2] (short) (narrow) %v479_v7, 16 }
 0x16d   : > { %v484_v13 = vpop.f32.mrb[20].mxu0 }
 0x16e   : > { %723 = vxpose.xlu1.b32.start [1/2] (short) (narrow) %v484_v13, 16  ;;  %v1649_v16 = vpop.f32.mrb[21].mxu0 }
 0x16f   : > { %v487_v19 = vpop.f32.mrb[22].mxu0 }
 0x170   : > { %v1650_v20 = vpop.f32.mrb[23].mxu0 }
 0x172   : > { %724 = vxpose.xlu1.b32.end [2/2] (short) (narrow) %v487_v19, 16 }
 0x175   : > { %v492_v21 = vpop.f32.mrb[24].mxu0 }
 0x176   : > { %755 = vxpose.xlu0.b32.start [1/2] (short) (narrow) %v492_v21, 16  ;;  %v1653_v22 = vpop.f32.mrb[25].mxu0 }
 0x177   : > { %v495_v23 = vpop.f32.mrb[26].mxu0 }
 0x178   : > { %v1654_v24 = vpop.f32.mrb[27].mxu0 }
 0x17a   : > { %756 = vxpose.xlu0.b32.end [2/2] (short) (narrow) %v495_v23, 16 }
 0x17d   : > { %v500_v25 = vpop.f32.mrb[28].mxu0 }
 0x17e   : > { %787 = vxpose.xlu1.b32.start [1/2] (short) (narrow) %v500_v25, 16  ;;  %v1657_v26 = vpop.f32.mrb[29].mxu0 }
 0x17f   : > { %v503_v27 = vpop.f32.mrb[30].mxu0 }
 0x180   : > { %v1658_v28 = vpop.f32.mrb[31].mxu0 }
 0x182   : > { %788 = vxpose.xlu1.b32.end [2/2] (short) (narrow) %v503_v27, 16 }
 0x185   : > { %v508_v29 = vpop.f32.mrb[32].mxu0 }
 0x186   : > { %819 = vxpose.xlu0.b32.start [1/2] (short) (narrow) %v508_v29, 16  ;;  %v1661_v30 = vpop.f32.mrb[33].mxu0 }
 0x187   : > { %v511_v31 = vpop.f32.mrb[34].mxu0 }
 0x188   : > { %v1662_v32 = vpop.f32.mrb[35].mxu0 }
 0x18a   : > { %820 = vxpose.xlu0.b32.end [2/2] (short) (narrow) %v511_v31, 16 }
 0x18d   : > { %v516_v33 = vpop.f32.mrb[36].mxu0 }
 0x18e   : > { %851 = vxpose.xlu1.b32.start [1/2] (short) (narrow) %v516_v33, 16  ;;  %v1665_v34 = vpop.f32.mrb[37].mxu0 }
 0x18f   : > { %v519_v35 = vpop.f32.mrb[38].mxu0 }
 0x190   : > { %v1666_v36 = vpop.f32.mrb[39].mxu0 }
 0x192   : > { %852 = vxpose.xlu1.b32.end [2/2] (short) (narrow) %v519_v35, 16 }
 0x195   : > { %v524_v37 = vpop.f32.mrb[40].mxu0 }
 0x196   : > { %883 = vxpose.xlu0.b32.start [1/2] (short) (narrow) %v524_v37, 16  ;;  %v1669_v38 = vpop.f32.mrb[41].mxu0 }
 0x197   : > { %v527_v39 = vpop.f32.mrb[42].mxu0 }
 0x198   : > { %v1670_v40 = vpop.f32.mrb[43].mxu0 }
 0x19a   : > { %884 = vxpose.xlu0.b32.end [2/2] (short) (narrow) %v527_v39, 16 }
 0x19d   : > { %v532_v41 = vpop.f32.mrb[44].mxu0 }
 0x19e   : > { %915 = vxpose.xlu1.b32.start [1/2] (short) (narrow) %v532_v41, 16  ;;  %v1673_v42 = vpop.f32.mrb[45].mxu0 }
 0x19f   : > { %v535_v43 = vpop.f32.mrb[46].mxu0 }
 0x1a0   : > { %v1674_v44 = vpop.f32.mrb[47].mxu0 }
 0x1a2   : > { %916 = vxpose.xlu1.b32.end [2/2] (short) (narrow) %v535_v43, 16 }
 0x1a5   : > { %v540_v45 = vpop.f32.mrb[48].mxu0 }
 0x1a6   : > { %947 = vxpose.xlu0.b32.start [1/2] (short) (narrow) %v540_v45, 16  ;;  %v1677_v46 = vpop.f32.mrb[49].mxu0 }
 0x1a7   : > { %v543_v47 = vpop.f32.mrb[50].mxu0 }
 0x1a8   : > { %v1678_v48 = vpop.f32.mrb[51].mxu0 }
 0x1aa   : > { %948 = vxpose.xlu0.b32.end [2/2] (short) (narrow) %v543_v47, 16 }
 0x1ad   : > { %v548_v49 = vpop.f32.mrb[52].mxu0 }
 0x1ae   : > { %979 = vxpose.xlu1.b32.start [1/2] (short) (narrow) %v548_v49, 16  ;;  %v1681_v50 = vpop.f32.mrb[53].mxu0 }
 0x1af   : > { %v551_v51 = vpop.f32.mrb[54].mxu0 }
 0x1b0   : > { %v1682_v52 = vpop.f32.mrb[55].mxu0 }
 0x1b1   : > { %v1394_v52 = vsub.f32 %v2194_v3, %v2223_v12 }
 0x1b2   : > { %980 = vxpose.xlu1.b32.end [2/2] (short) (narrow) %v551_v51, 16  ;;  %v1393_v51 = vsub.f32 %v2192_v2, %v2220_v11  ;;  %v1397_v2 = vsub.f32 %v2210_v8, %v2242_v17 }
 0x1b5   : > { %v556_v53 = vpop.f32.mrb[56].mxu0 }
 0x1b6   : > { %1011 = vxpose.xlu0.b32.start [1/2] (short) (narrow) %v556_v53, 16  ;;  %v1685_v54 = vpop.f32.mrb[57].mxu0  ;;  %v1395_v53 = vsub.f32 %v2201_v5, %v2231_v14  ;;  %v1398_v5 = vsub.f32 %v2212_v9, %v2245_v18  ;;  %v1403_v14 = vand.u32 2147483647, %v1397_v2 }
 0x1b7   : > { %v559_v55 = vpop.f32.mrb[58].mxu0  ;;  %v1399_v54 = vand.u32 2147483647, %v1393_v51 }
 0x1b8   : > { %v1686_v56 = vpop.f32.mrb[59].mxu0 }
 0x1b9   : > { %v1396_v56 = vsub.f32 %v2203_v6, %v2234_v15  ;;  %v1404_v15 = vand.u32 2147483647, %v1398_v5 }
 0x1ba   : > { %1012 = vxpose.xlu0.b32.end [2/2] (short) (narrow) %v559_v55, 16  ;;  %v1400_v55 = vand.u32 2147483647, %v1394_v52 }
 0x1bb   : > { %v1402_v11 = vand.u32 2147483647, %v1396_v56 }
 0x1c6   : > { %v579_v57 = vpop.trf.xlu0 }
 0x1ca   : > { %v580_v58 = vpop.trf.xlu0 }
 0x1cb   : > { %v1043_v59 = vpack.c.bf16 %v580_v58, %v579_v57  ;;  %v1401_v57 = vand.u32 2147483647, %v1395_v53  ;;  %v1406_v58 = vsel %vm364_vm1, %v1400_v55, 0.0 }
 0x1cd   : > { %1690 = vmatmul.mubr.msk.bf16.vlgmr.msra.gmra.mrb[0].mxu1 %vm364_vm1, %v1043_v59  ;;  %v1408_v3 = vsel %vm364_vm1, %v1401_v57, 0.0 }
 0x1ce   : > { %v611_v60 = vpop.trf.xlu1  ;;  %1693 = vmatprep.mubr.msk.bf16.mxu1 %vm1971_vm0, %v1970_v0 }
 0x1d2   : > { %v612_v61 = vpop.trf.xlu1 }
 0x1d3   : > { %v1044_v62 = vpack.c.bf16 %v612_v61, %v611_v60  ;;  %v1410_v60 = vsel %vm364_vm1, %v1402_v11, 0.0  ;;  %v1412_v61 = vsel %vm364_vm1, %v1403_v14, 0.0 }
 0x1d5   : > { %1694 = vmatmul.mubr.msk.bf16.gmra.mrb[4].mxu1 %vm364_vm1, %v1044_v62 }
 0x1d6   : > { %v643_v63 = vpop.trf.xlu0  ;;  %1697 = vmatprep.mubr.msk.bf16.mxu1 %vm1971_vm0, %v1970_v0 }
 0x1da   : > { %v644_v1 = vpop.trf.xlu0 }
 0x1db   : > { %v1045_v4 = vpack.c.bf16 %v644_v1, %v643_v63  ;;  %v1414_v63 = vsel %vm364_vm1, %v1404_v15, 0.0 }
 0x1dd   : > { %1698 = vmatmul.mubr.msk.bf16.gmra.mrb[8].mxu1 %vm364_vm1, %v1045_v4 }
 0x1de   : > { %v675_v7 = vpop.trf.xlu1  ;;  %1701 = vmatprep.mubr.msk.bf16.mxu1 %vm1971_vm0, %v1970_v0 }
 0x1e2   : > { %v676_v10 = vpop.trf.xlu1 }
 0x1e3   : > { %v1046_v13 = vpack.c.bf16 %v676_v10, %v675_v7 }
 0x1e5   : > { %1702 = vmatmul.mubr.msk.bf16.gmra.mrb[12].mxu1 %vm364_vm1, %v1046_v13 }
 0x1e6   : > { %v707_v16 = vpop.trf.xlu0  ;;  %1705 = vmatprep.mubr.msk.bf16.mxu1 %vm1971_vm0, %v1970_v0 }
 0x1ea   : > { %v708_v19 = vpop.trf.xlu0 }
 0x1eb   : > { %v1047_v20 = vpack.c.bf16 %v708_v19, %v707_v16 }
 0x1ed   : > { %1706 = vmatmul.mubr.msk.bf16.gmra.mrb[16].mxu1 %vm364_vm1, %v1047_v20 }
 0x1ee   : > { %v739_v21 = vpop.trf.xlu1  ;;  %1709 = vmatprep.mubr.msk.bf16.mxu1 %vm1971_vm0, %v1970_v0 }
 0x1f2   : > { %v740_v22 = vpop.trf.xlu1 }
 0x1f3   : > { %v1048_v23 = vpack.c.bf16 %v740_v22, %v739_v21 }
 0x1f5   : > { %1710 = vmatmul.mubr.msk.bf16.gmra.mrb[20].mxu1 %vm364_vm1, %v1048_v23 }
 0x1f6   : > { %v771_v24 = vpop.trf.xlu0  ;;  %1713 = vmatprep.mubr.msk.bf16.mxu1 %vm1971_vm0, %v1970_v0 }
 0x1fa   : > { %v772_v25 = vpop.trf.xlu0 }
 0x1fb   : > { %v1049_v26 = vpack.c.bf16 %v772_v25, %v771_v24 }
 0x1fd   : > { %1714 = vmatmul.mubr.msk.bf16.gmra.mrb[24].mxu1 %vm364_vm1, %v1049_v26 }
 0x1fe   : > { %v803_v27 = vpop.trf.xlu1  ;;  %1717 = vmatprep.mubr.msk.bf16.mxu1 %vm1971_vm0, %v1970_v0 }
 0x202   : > { %v804_v28 = vpop.trf.xlu1 }
 0x203   : > { %v1050_v29 = vpack.c.bf16 %v804_v28, %v803_v27 }
 0x205   : > { %1718 = vmatmul.mubr.msk.bf16.gmra.mrb[28].mxu1 %vm364_vm1, %v1050_v29 }
 0x206   : > { %v835_v30 = vpop.trf.xlu0  ;;  %1721 = vmatprep.mubr.msk.bf16.mxu1 %vm1971_vm0, %v1970_v0 }
 0x20a   : > { %v836_v31 = vpop.trf.xlu0 }
 0x20b   : > { %v1051_v32 = vpack.c.bf16 %v836_v31, %v835_v30 }
 0x20d   : > { %1722 = vmatmul.mubr.msk.bf16.gmra.mrb[32].mxu1 %vm364_vm1, %v1051_v32 }
 0x20e   : > { %v867_v33 = vpop.trf.xlu1  ;;  %1725 = vmatprep.mubr.msk.bf16.mxu1 %vm1971_vm0, %v1970_v0 }
 0x212   : > { %v868_v34 = vpop.trf.xlu1 }
 0x213   : > { %v1052_v35 = vpack.c.bf16 %v868_v34, %v867_v33 }
 0x215   : > { %1726 = vmatmul.mubr.msk.bf16.gmra.mrb[36].mxu1 %vm364_vm1, %v1052_v35 }
 0x216   : > { %v899_v36 = vpop.trf.xlu0  ;;  %1729 = vmatprep.mubr.msk.bf16.mxu1 %vm1971_vm0, %v1970_v0 }
 0x21a   : > { %v900_v37 = vpop.trf.xlu0 }
 0x21b   : > { %v1053_v38 = vpack.c.bf16 %v900_v37, %v899_v36 }
 0x21d   : > { %1730 = vmatmul.mubr.msk.bf16.gmra.mrb[40].mxu1 %vm364_vm1, %v1053_v38 }
 0x21e   : > { %v931_v39 = vpop.trf.xlu1  ;;  %1733 = vmatprep.mubr.msk.bf16.mxu1 %vm1971_vm0, %v1970_v0 }
 0x222   : > { %v932_v40 = vpop.trf.xlu1 }
 0x223   : > { %v1054_v41 = vpack.c.bf16 %v932_v40, %v931_v39 }
 0x225   : > { %1734 = vmatmul.mubr.msk.bf16.gmra.mrb[44].mxu1 %vm364_vm1, %v1054_v41 }
 0x226   : > { %v963_v42 = vpop.trf.xlu0  ;;  %1737 = vmatprep.mubr.msk.bf16.mxu1 %vm1971_vm0, %v1970_v0 }
 0x22a   : > { %v964_v43 = vpop.trf.xlu0 }
 0x22b   : > { %v1055_v44 = vpack.c.bf16 %v964_v43, %v963_v42 }
 0x22d   : > { %1738 = vmatmul.mubr.msk.bf16.gmra.mrb[48].mxu1 %vm364_vm1, %v1055_v44 }
 0x22e   : > { %v995_v45 = vpop.trf.xlu1  ;;  %1741 = vmatprep.mubr.msk.bf16.mxu1 %vm1971_vm0, %v1970_v0 }
 0x232   : > { %v996_v46 = vpop.trf.xlu1 }
 0x233   : > { %v1056_v47 = vpack.c.bf16 %v996_v46, %v995_v45 }
 0x235   : > { %1742 = vmatmul.mubr.msk.bf16.gmra.mrb[52].mxu1 %vm364_vm1, %v1056_v47 }
 0x236   : > { %v1027_v48 = vpop.trf.xlu0  ;;  %1745 = vmatprep.mubr.msk.bf16.mxu1 %vm1971_vm0, %v1970_v0  ;;  %v1405_v0 = vsel %vm364_vm1, %v1399_v54, 0.0 }
 0x237   : > { %v1407_v59 = vadd.f32 %v1406_v58, %v1405_v0 }
 0x239   : > { %v1409_v12 = vadd.f32 %v1408_v3, %v1407_v59 }
 0x23a   : > { %v1028_v49 = vpop.trf.xlu0 }
 0x23b   : > { %v1057_v50 = vpack.c.bf16 %v1028_v49, %v1027_v48  ;;  %v1411_v6 = vadd.f32 %v1410_v60, %v1409_v12 }
 0x23d   : > { %1746 = vmatmul.mubr.msk.bf16.gmra.mrb[56].mxu1 %vm364_vm1, %v1057_v50  ;;  %v1413_v62 = vadd.f32 %v1412_v61, %v1411_v6 }
 0x23f   : > { %v1415_v1 = vadd.f32 %v1414_v63, %v1413_v62 }
 0x241   : > { %1416 = vadd.xlane.f32.xlu0 %v1415_v1 }
 0x2a0   : > { %v1143_v8 = vpop.f32.mrb[0].mxu1 }
 0x2a1   : > { %v1691_v17 = vpop.f32.mrb[1].mxu1  ;;  %v1262_v23 = vmul.f32 %v1143_v8, %v1143_v8 }
 0x2a2   : > { %v1146_v4 = vpop.f32.mrb[2].mxu1 }
 0x2a3   : > { %v1692_v7 = vpop.f32.mrb[3].mxu1  ;;  %v1263_v28 = vmul.f32 %v1146_v4, %v1146_v4 }
 0x2a8   : > { %v1151_v10 = vpop.f32.mrb[4].mxu1 }
 0x2a9   : > { %v1695_v13 = vpop.f32.mrb[5].mxu1  ;;  %v1264_v35 = vmul.f32 %v1151_v10, %v1151_v10 }
 0x2aa   : > { %v1154_v16 = vpop.f32.mrb[6].mxu1 }
 0x2ab   : > { %v1696_v9 = vpop.f32.mrb[7].mxu1  ;;  %v1265_v40 = vmul.f32 %v1154_v16, %v1154_v16 }
 0x2b0   : > { %v1159_v18 = vpop.f32.mrb[8].mxu1 }
 0x2b1   : > { %v1699_v19 = vpop.f32.mrb[9].mxu1  ;;  %v1266_v47 = vmul.f32 %v1159_v18, %v1159_v18 }
 0x2b2   : > { %v1162_v20 = vpop.f32.mrb[10].mxu1 }
 0x2b3   : > { %v1700_v21 = vpop.f32.mrb[11].mxu1  ;;  %v1267_v52 = vmul.f32 %v1162_v20, %v1162_v20 }
 0x2b8   : > { %v1167_v22 = vpop.f32.mrb[12].mxu1 }
 0x2b9   : > { %v1268_v24 = vmul.f32 %v1167_v22, %v1167_v22  ;;  %v2374_v25 = vmul.f32 %v1167_v22, %v1143_v8  ;;  %v1703_v26 = vpop.f32.mrb[13].mxu1 }
 0x2ba   : > { %v1170_v27 = vpop.f32.mrb[14].mxu1 }
 0x2bb   : > { %v1328_v29 = vadd.f32 %v1268_v24, %v1262_v23  ;;  %v1269_v30 = vmul.f32 %v1170_v27, %v1170_v27  ;;  %v2376_v31 = vmul.f32 %v1170_v27, %v1146_v4  ;;  %v1704_v32 = vpop.f32.mrb[15].mxu1 }
 0x2bd   : > { %v1329_v33 = vadd.f32 %v1269_v30, %v1263_v28  ;;  %v1334_v19 = vadd.f32 0.0001, %v1328_v29 }
 0x2bf   : > { %v1335_v22 = vadd.f32 0.0001, %v1329_v33 }
 0x2c0   : > { %v1175_v34 = vpop.f32.mrb[16].mxu1 }
 0x2c1   : > { %v1270_v36 = vmul.f32 %v1175_v34, %v1175_v34  ;;  %v2378_v37 = vmul.f32 %v1175_v34, %v1151_v10  ;;  %v1707_v38 = vpop.f32.mrb[17].mxu1 }
 0x2c2   : > { %v1178_v39 = vpop.f32.mrb[18].mxu1 }
 0x2c3   : > { %v1330_v41 = vadd.f32 %v1270_v36, %v1264_v35  ;;  %v1271_v42 = vmul.f32 %v1178_v39, %v1178_v39  ;;  %v2380_v43 = vmul.f32 %v1178_v39, %v1154_v16  ;;  %v1708_v44 = vpop.f32.mrb[19].mxu1 }
 0x2c5   : > { %v1331_v45 = vadd.f32 %v1271_v42, %v1265_v40 }
 0x2c8   : > { %v1183_v46 = vpop.f32.mrb[20].mxu1 }
 0x2c9   : > { %v1272_v48 = vmul.f32 %v1183_v46, %v1183_v46  ;;  %v2382_v49 = vmul.f32 %v1183_v46, %v1159_v18  ;;  %v1711_v50 = vpop.f32.mrb[21].mxu1 }
 0x2ca   : > { %v1186_v51 = vpop.f32.mrb[22].mxu1 }
 0x2cb   : > { %v1332_v53 = vadd.f32 %v1272_v48, %v1266_v47  ;;  %v1273_v54 = vmul.f32 %v1186_v51, %v1186_v51  ;;  %v2384_v55 = vmul.f32 %v1186_v51, %v1162_v20  ;;  %v1712_v56 = vpop.f32.mrb[23].mxu1 }
 0x2cd   : > { %v1333_v57 = vadd.f32 %v1273_v54, %v1267_v52 }
 0x2d0   : > { %v1191_v0 = vpop.f32.mrb[24].mxu1 }
 0x2d1   : > { %v1280_v58 = vsub.f32 %v1191_v0, %v1262_v23  ;;  %v1715_v59 = vpop.f32.mrb[25].mxu1 }
 0x2d2   : > { %v1194_v2 = vpop.f32.mrb[26].mxu1 }
 0x2d3   : > { %v1281_v11 = vsub.f32 %v1194_v2, %v1263_v28  ;;  %v1716_v3 = vpop.f32.mrb[27].mxu1 }
 0x2d8   : > { %v1199_v12 = vpop.f32.mrb[28].mxu1 }
 0x2d9   : > { %v1282_v5 = vsub.f32 %v1199_v12, %v1264_v35  ;;  %v1719_v14 = vpop.f32.mrb[29].mxu1 }
 0x2da   : > { %v1202_v60 = vpop.f32.mrb[30].mxu1 }
 0x2db   : > { %v1283_v6 = vsub.f32 %v1202_v60, %v1265_v40  ;;  %v1720_v15 = vpop.f32.mrb[31].mxu1 }
 0x2e0   : > { %v1207_v61 = vpop.f32.mrb[32].mxu1 }
 0x2e1   : > { %v1284_v62 = vsub.f32 %v1207_v61, %v1266_v47  ;;  %v1723_v63 = vpop.f32.mrb[33].mxu1  ;;  %v1337_v47 = vadd.f32 0.0001, %v1331_v45  ;;  %v1298_v45 = vmul.f32 2.0, %v2374_v25 }
 0x2e2   : > { %v1210_v1 = vpop.f32.mrb[34].mxu1 }
 0x2e3   : > { %v1285_v8 = vsub.f32 %v1210_v1, %v1267_v52  ;;  %v1724_v17 = vpop.f32.mrb[35].mxu1  ;;  %v1304_v61 = vadd.f32 0.0001, %v1298_v45 }
 0x2e8   : > { %v1215_v4 = vpop.f32.mrb[36].mxu1 }
 0x2e9   : > { %v1286_v7 = vsub.f32 %v1215_v4, %v1268_v24  ;;  %v1727_v10 = vpop.f32.mrb[37].mxu1  ;;  %v1336_v24 = vadd.f32 0.0001, %v1330_v41  ;;  %v1300_v4 = vmul.f32 2.0, %v2378_v37 }
 0x2ea   : > { %v1218_v13 = vpop.f32.mrb[38].mxu1 }
 0x2eb   : > { %v1340_v16 = vadd.f32 %v1286_v7, %v1280_v58  ;;  %v1287_v9 = vsub.f32 %v1218_v13, %v1269_v30  ;;  %v1728_v18 = vpop.f32.mrb[39].mxu1 }
 0x2ec   : > { %v1301_v18 = vmul.f32 2.0, %v2380_v43 }
 0x2ed   : > { %v1346_v20 = vadd.f32 0.0009, %v1340_v16  ;;  %v1341_v21 = vadd.f32 %v1287_v9, %v1281_v11 }
 0x2ef   : > { %v1352_v23 = vmul.f32 %v1346_v20, %v1334_v19  ;;  %v1347_v26 = vadd.f32 0.0009, %v1341_v21 }
 0x2f0   : > { %v1223_v27 = vpop.f32.mrb[40].mxu1 }
 0x2f1   : > { %v1353_v28 = vmul.f32 %v1347_v26, %v1335_v22  ;;  %v1288_v32 = vsub.f32 %v1223_v27, %v1270_v36  ;;  %v1731_v34 = vpop.f32.mrb[41].mxu1  ;;  %v1338_v36 = vadd.f32 0.0001, %v1332_v53  ;;  %1819 = vrcp.f32 %v1352_v23 }
 0x2f2   : > { %v1226_v35 = vpop.f32.mrb[42].mxu1  ;;  %v1306_v23 = vadd.f32 0.0001, %v1300_v4 }
 0x2f3   : > { %v1342_v38 = vadd.f32 %v1288_v32, %v1282_v5  ;;  %v1289_v39 = vsub.f32 %v1226_v35, %v1271_v42  ;;  %v1732_v40 = vpop.f32.mrb[43].mxu1  ;;  %v1339_v42 = vadd.f32 0.0001, %v1333_v57  ;;  %1821 = vrcp.f32 %v1353_v28 }
 0x2f5   : > { %v1348_v44 = vadd.f32 0.0009, %v1342_v38  ;;  %v1343_v46 = vadd.f32 %v1289_v39, %v1283_v6  ;;  %v1299_v6 = vmul.f32 2.0, %v2376_v31 }
 0x2f7   : > { %v1354_v30 = vmul.f32 %v1348_v44, %v1336_v24  ;;  %v1349_v50 = vadd.f32 0.0009, %v1343_v46  ;;  %v1305_v63 = vadd.f32 0.0001, %v1299_v6  ;;  %v1302_v24 = vmul.f32 2.0, %v2382_v49 }
 0x2f8   : > { %v1231_v29 = vpop.f32.mrb[44].mxu1 }
 0x2f9   : > { %v1355_v51 = vmul.f32 %v1349_v50, %v1337_v47  ;;  %v1290_v52 = vsub.f32 %v1231_v29, %v1272_v48  ;;  %v1735_v33 = vpop.f32.mrb[45].mxu1  ;;  %1823 = vrcp.f32 %v1354_v30  ;;  %v1303_v50 = vmul.f32 2.0, %v2384_v55 }
 0x2fa   : > { %v1234_v56 = vpop.f32.mrb[46].mxu1 }
 0x2fb   : > { %v1344_v0 = vadd.f32 %v1290_v52, %v1284_v62  ;;  %v1291_v58 = vsub.f32 %v1234_v56, %v1273_v54  ;;  %v1736_v59 = vpop.f32.mrb[47].mxu1  ;;  %v1820_v17 = vpop.eup %1819  ;;  %1825 = vrcp.f32 %v1355_v51 }
 0x2fc   : > { %v1308_v59 = vadd.f32 0.0001, %v1302_v24 }
 0x2fd   : > { %v1350_v2 = vadd.f32 0.0009, %v1344_v0  ;;  %v1345_v11 = vadd.f32 %v1291_v58, %v1285_v8  ;;  %v1822_v9 = vpop.eup %1821 }
 0x2ff   : > { %v1356_v3 = vmul.f32 %v1350_v2, %v1338_v36  ;;  %v1351_v41 = vadd.f32 0.0009, %v1345_v11 }
 0x300   : > { %v1239_v12 = vpop.f32.mrb[48].mxu1 }
 0x301   : > { %v1357_v5 = vmul.f32 %v1351_v41, %v1339_v42  ;;  %v1292_v14 = vsub.f32 %v1239_v12, %v2374_v25  ;;  %v1739_v48 = vpop.f32.mrb[49].mxu1  ;;  %1827 = vrcp.f32 %v1356_v3 }
 0x302   : > { %v1242_v60 = vpop.f32.mrb[50].mxu1 }
 0x303   : > { %v1310_v54 = vmul.f32 2.0, %v1292_v14  ;;  %v1293_v53 = vsub.f32 %v1242_v60, %v2376_v31  ;;  %v1740_v15 = vpop.f32.mrb[51].mxu1  ;;  %v1824_v39 = vpop.eup %1823  ;;  %1829 = vrcp.f32 %v1357_v5 }
 0x305   : > { %v1316_v62 = vadd.f32 0.0009, %v1310_v54  ;;  %v1311_v57 = vmul.f32 2.0, %v1293_v53  ;;  %v1826_v30 = vpop.eup %1825  ;;  %v1417_v53 = vpop.xlane.xlu0 %1416 }
 0x306   : > { %v1418_v15 = vrot.slane %v1417_v53, 4 }
 0x307   : > { %v1322_v1 = vmul.f32 %v1316_v62, %v1304_v61  ;;  %v1317_v8 = vadd.f32 0.0009, %v1311_v57 }
 0x308   : > { %v1247_v25 = vpop.f32.mrb[52].mxu1  ;;  %v1419_v61 = vadd.f32 %v1418_v15, %v1417_v53 }
 0x309   : > { %v1364_v7 = vmul.f32 %v1820_v17, %v1322_v1  ;;  %v1323_v10 = vmul.f32 %v1317_v8, %v1305_v63  ;;  %v1294_v13 = vsub.f32 %v1247_v25, %v2378_v37  ;;  %v1743_v16 = vpop.f32.mrb[53].mxu1  ;;  %v1307_v37 = vadd.f32 0.0001, %v1301_v18 }
 0x30a   : > { %v1250_v31 = vpop.f32.mrb[54].mxu1  ;;  %v1420_v62 = vrot.slane %v1419_v61, 2 }
 0x30b   : > { %v1365_v19 = vmul.f32 %v1822_v9, %v1323_v10  ;;  %v1312_v20 = vmul.f32 2.0, %v1294_v13  ;;  %v1295_v21 = vsub.f32 %v1250_v31, %v2380_v43  ;;  %v1744_v22 = vpop.f32.mrb[55].mxu1  ;;  %v1370_v26 = vsel %vm364_vm1, %v1364_v7, 0.0  ;;  %v1828_v12 = vpop.eup %1827 }
 0x30c   : > { %v1421_v8 = vadd.f32 %v1420_v62, %v1419_v61 }
 0x30d   : > { %v1371_v27 = vsel %vm364_vm1, %v1365_v19, 0.0  ;;  %v1318_v28 = vadd.f32 0.0009, %v1312_v20  ;;  %v1313_v32 = vmul.f32 2.0, %v1295_v21  ;;  %v1830_v14 = vpop.eup %1829 }
 0x30e   : > { %v1372_v34 = vadd.f32 %v1371_v27, %v1370_v26  ;;  %v1422_v25 = vrot.slane %v1421_v8, 1 }
 0x30f   : > { %v1324_v35 = vmul.f32 %v1318_v28, %v1306_v23  ;;  %v1319_v38 = vadd.f32 0.0009, %v1313_v32 }
 0x310   : > { %v1255_v40 = vpop.f32.mrb[56].mxu1  ;;  %v1423_v13 = vadd.f32 %v1422_v25, %v1421_v8 }
 0x311   : > { %v1366_v44 = vmul.f32 %v1824_v39, %v1324_v35  ;;  %v1325_v43 = vmul.f32 %v1319_v38, %v1307_v37  ;;  %v1296_v46 = vsub.f32 %v1255_v40, %v2382_v49  ;;  %v1747_v47 = vpop.f32.mrb[57].mxu1  ;;  %v1309_v49 = vadd.f32 0.0001, %v1303_v50 }
 0x312   : > { %v1258_v29 = vpop.f32.mrb[58].mxu1 }
 0x313   : > { %v1373_v51 = vsel %vm364_vm1, %v1366_v44, 0.0  ;;  %v1367_v52 = vmul.f32 %v1826_v30, %v1325_v43  ;;  %v1314_v33 = vmul.f32 2.0, %v1296_v46  ;;  %v1297_v56 = vsub.f32 %v1258_v29, %v2384_v55  ;;  %v1748_v0 = vpop.f32.mrb[59].mxu1 }
 0x314   : > { %v1374_v58 = vadd.f32 %v1373_v51, %v1372_v34 }
 0x315   : > { %v1320_v36 = vadd.f32 0.0009, %v1314_v33  ;;  %v1315_v2 = vmul.f32 2.0, %v1297_v56  ;;  %v1375_v11 = vsel %vm364_vm1, %v1367_v52, 0.0 }
 0x316   : > { %v1376_v42 = vadd.f32 %v1375_v11, %v1374_v58 }
 0x317   : > { %v1326_v3 = vmul.f32 %v1320_v36, %v1308_v59  ;;  %v1321_v41 = vadd.f32 0.0009, %v1315_v2 }
 0x319   : > { %v1368_v45 = vmul.f32 %v1828_v12, %v1326_v3  ;;  %v1327_v5 = vmul.f32 %v1321_v41, %v1309_v49 }
 0x31b   : > { %v1369_v48 = vmul.f32 %v1830_v14, %v1327_v5  ;;  %v1377_v60 = vsel %vm364_vm1, %v1368_v45, 0.0 }
 0x31c   : > { %v1378_v6 = vadd.f32 %v1377_v60, %v1376_v42 }
 0x31d   : > { %v1379_v55 = vsel %vm364_vm1, %v1369_v48, 0.0 }
 0x31e   : > { %v1380_v54 = vadd.f32 %v1379_v55, %v1378_v6 }
 0x320   : > { %1381 = vadd.xlane.f32.xlu1 %v1380_v54 }
 0x3ad   : > { %v1382_v57 = vpop.xlane.xlu1 %1381 }
 0x3ae   : > { %v1383_v63 = vrot.slane %v1382_v57, 4 }
 0x3b0   : > { %v1384_v1 = vadd.f32 %v1383_v63, %v1382_v57 }
 0x3b2   : > { %v1385_v17 = vrot.slane %v1384_v1, 2 }
 0x3b4   : > { %v1386_v4 = vadd.f32 %v1385_v17, %v1384_v1 }
 0x3b6   : > { %v1387_v7 = vrot.slane %v1386_v4, 1 }
 0x3b8   : > { %v1388_v10 = vadd.f32 %v1387_v7, %v1386_v4 }
 0x3ba   : > { %1752 = vpush %v1388_v10 }
 0x3bb   : > { %1754 = vpush %v1423_v13 }
 0x3eb   : > { %s1753_s25 = spop %1752 }
 0x3ec   : > { %v1390_v16 = vstv %s1753_s25  ;;  %s1755_s21 = spop %1754 }
 0x3ed   : > { %1392 = vst.msk [vmem:[%s304_s16] sm:$0x1] %vm1391_vm2, %v1390_v16  ;;  %v1425_v9 = vstv %s1755_s21 }
 0x3ee   : > { %1426 = vst.msk [vmem:[%s307_s29] sm:$0x1] %vm1391_vm2, %v1425_v9 }
 0x3ef PF: > { %s2442_s6 = smov %s2072_s18  ;;  %p19_p9 = scmp.ge.s32.totalorder %s2046_s28, 4  }
 0x3f0   : > { %s2443_s18 = smov %s1953_s19  ;;  %s2444_s19 = smov %s1957_s20 }
 0x3f1   : > { %s2445_s20 = smov %s2442_s6  ;;  %s2446_s21 = smov %s2046_s28 }
 0x3f2   :  { %21 = sbr.rel (!%p19_p9) target bundleno = 5 (0x5), region = 105 }
 0x3f9   :  { %1456 = vsyncpa [#allocation3], 1 }
 0x3fa   :  { %1458 = vsyncpa [#allocation3 + $0x1], 1 }
 0x3fb   :  { %1459 = vsyncpa [#allocation5], 1 }
 0x3fc   :  { %1461 = vsyncpa [#allocation5 + $0x1], 1 }

</bundles_post_ra>
